<compile_context>
chip_gen: v7x
topology: tpu7x:2x2x1
jax: 0.10.0
libtpu: 0.0.40
codegen_flags: <defaults>
</compile_context>

<pallas_src>
import functools

import jax
import jax.numpy as jnp
from jax.experimental import pallas as pl
from jax.experimental.pallas import tpu as pltpu


def _round_up(x, m):
    return ((x + m - 1) // m) * m


def _mlp_kernel(x_ref, w_ref, b_ref, o_ref, *, dims, w_offs):
    """One batch tile of the fused 4-layer MLP.

    x_ref: (n_obs, TB)            bf16  activation tile (features x batch)
    w_ref: (sum_out_pad, max_in)  bf16  packed weights, torch-native (out, in)
    b_ref: (max_out_pad, n_layer) f32   packed biases (one column per layer)
    o_ref: (n_action, TB)         f32
    """
    h = x_ref[...]                                          # bf16 (n_obs, TB)
    n_layers = len(dims)
    for li, (d_in, d_out) in enumerate(dims):
        off = w_offs[li]
        w = w_ref[off:off + d_out, :d_in]                   # static slice, bf16 (d_out, d_in)
        b = b_ref[0:d_out, li:li + 1]                       # static slice, f32  (d_out, 1)
        h = jnp.dot(w, h, preferred_element_type=jnp.float32) + b   # MXU, f32 accumulate
        if li < n_layers - 1:
            h = jnp.maximum(h, 0.0).astype(jnp.bfloat16)    # VPU relu; bf16 for next MXU pass
    o_ref[...] = h.astype(o_ref.dtype)


def pack_params(params, n_layers=4):
    """Pack torch-native (out,in) weights + (out,) biases into two slabs."""
    ws = [params[f"w{i}"] for i in range(1, n_layers + 1)]
    bs = [params[f"b{i}"] for i in range(1, n_layers + 1)]

    # Weight slab: each layer's rows start at a multiple of 16 (bf16 sublane
    # tile) so in-kernel static slices stay tile-aligned.
    w_offs, rows = [], 0
    for w in ws:
        w_offs.append(rows)
        rows += _round_up(w.shape[0], 16)
    max_in = max(w.shape[1] for w in ws)
    w_slab = jnp.zeros((rows, max_in), jnp.bfloat16)
    for off, w in zip(w_offs, ws):
        w_slab = w_slab.at[off:off + w.shape[0], :w.shape[1]].set(
            w.astype(jnp.bfloat16))

    # Bias slab: column j = bias of layer j, kept in f32 (bias-add runs in f32).
    max_out = _round_up(max(b.shape[0] for b in bs), 8)
    b_slab = jnp.zeros((max_out, n_layers), jnp.float32)
    for j, b in enumerate(bs):
        b_slab = b_slab.at[:b.shape[0], j].set(b.astype(jnp.float32))

    dims = tuple((int(w.shape[1]), int(w.shape[0])) for w in ws)
    return w_slab, b_slab, tuple(w_offs), dims


def dqn_forward(x, params, *, tb=128):
    """x: [B, n_obs] f32 -> [B, n_action] f32 (same math as the torch module)."""
    B, n_obs = x.shape
    w_slab, b_slab, w_offs, dims = pack_params(params)
    n_action = dims[-1][1]

    # Feature-major layout: batch on the lane axis; pad batch to a tile multiple.
    b_pad = _round_up(B, tb)
    xt = x.T.astype(jnp.bfloat16)
    if b_pad != B:
        xt = jnp.pad(xt, ((0, 0), (0, b_pad - B)))

    kernel = functools.partial(_mlp_kernel, dims=dims, w_offs=w_offs)

    out_t = pl.pallas_call(
        kernel,
        out_shape=jax.ShapeDtypeStruct((n_action, b_pad), jnp.float32),
        grid=(pl.cdiv(b_pad, tb),),
        in_specs=[
            pl.BlockSpec((n_obs, tb), lambda i: (0, i)),   # pipelined activation tile
            pl.BlockSpec(w_slab.shape, lambda i: (0, 0)),  # weights VMEM-resident across grid
            pl.BlockSpec(b_slab.shape, lambda i: (0, 0)),  # biases VMEM-resident across grid
        ],
        out_specs=pl.BlockSpec((n_action, tb), lambda i: (0, i)),
        compiler_params=pltpu.CompilerParams(
            dimension_semantics=("parallel",)),            # v7x: shard batch tiles across TCs
    )(xt, w_slab, b_slab)

    return out_t[:, :B].T


def init_params(key, n_obs, n_action, h1=16, h2=16, h3=4):
    """torch.nn.Linear-style init; weights torch-native (out_features, in_features)."""
    layer_dims = [(n_obs, h1), (h1, h2), (h2, h3), (h3, n_action)]
    params = {}
    for i, (fan_in, fan_out) in enumerate(layer_dims, start=1):
        key, kw, kb = jax.random.split(key, 3)
        bound = 1.0 / jnp.sqrt(jnp.float32(fan_in))
        params[f"w{i}"] = jax.random.uniform(
            kw, (fan_out, fan_in), jnp.float32, minval=-bound, maxval=bound)
        params[f"b{i}"] = jax.random.uniform(
            kb, (fan_out,), jnp.float32, minval=-bound, maxval=bound)
    return params


def dqn_reference(x, p):
    h = jnp.maximum(x @ p["w1"].T + p["b1"], 0.0)
    h = jnp.maximum(h @ p["w2"].T + p["b2"], 0.0)
    h = jnp.maximum(h @ p["w3"].T + p["b3"], 0.0)
    return h @ p["w4"].T + p["b4"]


if __name__ == "__main__":
    key = jax.random.PRNGKey(0)
    n_obs, n_action = 32, 8
    batch = 200                     # not a tile multiple: exercises padding + a 2-step grid

    kx, kp = jax.random.split(key)
    x = jax.random.normal(kx, (batch, n_obs), jnp.float32)
    params = init_params(kp, n_obs, n_action)

    out = jax.block_until_ready(dqn_forward(x, params))
    ref = dqn_reference(x, params)

    assert out.shape == (batch, n_action)
    # bf16 MXU inputs vs f32 reference: allow ~1e-2-level deviation.
    max_err = float(jnp.max(jnp.abs(out - ref)))
    assert max_err < 5e-2, f"mismatch vs reference (max abs err {max_err})"

    print("KERNEL_OK")
</pallas_src>

<mosaic_0001>
module attributes {stable_mosaic.version = 11 : i64} {
  func.func @_mlp_kernel(%arg0: i32, %arg1: memref<32x128xbf16, #tpu.memory_space<vmem>>, %arg2: memref<64x32xbf16, #tpu.memory_space<vmem>>, %arg3: memref<16x4xf32, #tpu.memory_space<vmem>>, %arg4: memref<8x128xf32, #tpu.memory_space<vmem>>) attributes {dimension_semantics = [#tpu.dimension_semantics<parallel>], iteration_bounds = array<i64: 2>, scalar_prefetch = 0 : i64, scratch_operands = 0 : i64, tpu.core_type = #tpu.core_type<tc>, window_params = [{transform_indices = @transform_0, window_bounds = array<i64: 32, 128>}, {pipeline_mode = #tpu.pipeline_mode<synchronous>, transform_indices = @transform_1, window_bounds = array<i64: 64, 32>}, {pipeline_mode = #tpu.pipeline_mode<synchronous>, transform_indices = @transform_2, window_bounds = array<i64: 16, 4>}, {transform_indices = @transform_3, window_bounds = array<i64: 8, 128>}]} {
    %c0 = arith.constant 0 : index
    %c0_0 = arith.constant 0 : index
    %0 = vector.load %arg1[%c0, %c0_0] : memref<32x128xbf16, #tpu.memory_space<vmem>>, vector<32x128xbf16>
    %c0_1 = arith.constant 0 : index
    %c0_2 = arith.constant 0 : index
    %1 = vector.load %arg2[%c0_1, %c0_2] : memref<64x32xbf16, #tpu.memory_space<vmem>>, vector<16x32xbf16>
    %c0_3 = arith.constant 0 : index
    %c0_4 = arith.constant 0 : index
    %2 = vector.load %arg3[%c0_3, %c0_4] : memref<16x4xf32, #tpu.memory_space<vmem>>, vector<16x1xf32>
    %cst = arith.constant dense<0.000000e+00> : vector<16x128xf32>
    %3 = tpu.matmul %1, %0, %cst {dimension_numbers = #tpu.dot_dimension_numbers<[1], [0], [0], [1], [0, 0, 1, 1], [], []>} : vector<16x32xbf16>, vector<32x128xbf16>, vector<16x128xf32> -> vector<16x128xf32>
    %4 = vector.broadcast %2 : vector<16x1xf32> to vector<16x128xf32>
    %5 = arith.addf %3, %4 : vector<16x128xf32>
    %cst_5 = arith.constant 0.000000e+00 : f32
    %6 = vector.broadcast %cst_5 : f32 to vector<16x128xf32>
    %7 = arith.maximumf %5, %6 : vector<16x128xf32>
    %8 = arith.truncf %7 : vector<16x128xf32> to vector<16x128xbf16>
    %c16 = arith.constant 16 : index
    %c0_6 = arith.constant 0 : index
    %9 = vector.load %arg2[%c16, %c0_6] : memref<64x32xbf16, #tpu.memory_space<vmem>>, vector<16x16xbf16>
    %c0_7 = arith.constant 0 : index
    %c1 = arith.constant 1 : index
    %10 = vector.load %arg3[%c0_7, %c1] : memref<16x4xf32, #tpu.memory_space<vmem>>, vector<16x1xf32>
    %cst_8 = arith.constant dense<0.000000e+00> : vector<16x128xf32>
    %11 = tpu.matmul %9, %8, %cst_8 {dimension_numbers = #tpu.dot_dimension_numbers<[1], [0], [0], [1], [0, 0, 1, 1], [], []>} : vector<16x16xbf16>, vector<16x128xbf16>, vector<16x128xf32> -> vector<16x128xf32>
    %12 = vector.broadcast %10 : vector<16x1xf32> to vector<16x128xf32>
    %13 = arith.addf %11, %12 : vector<16x128xf32>
    %cst_9 = arith.constant 0.000000e+00 : f32
    %14 = vector.broadcast %cst_9 : f32 to vector<16x128xf32>
    %15 = arith.maximumf %13, %14 : vector<16x128xf32>
    %16 = arith.truncf %15 : vector<16x128xf32> to vector<16x128xbf16>
    %c32 = arith.constant 32 : index
    %c0_10 = arith.constant 0 : index
    %17 = vector.load %arg2[%c32, %c0_10] : memref<64x32xbf16, #tpu.memory_space<vmem>>, vector<4x16xbf16>
    %c0_11 = arith.constant 0 : index
    %c2 = arith.constant 2 : index
    %18 = vector.load %arg3[%c0_11, %c2] : memref<16x4xf32, #tpu.memory_space<vmem>>, vector<4x1xf32>
    %cst_12 = arith.constant dense<0.000000e+00> : vector<4x128xf32>
    %19 = tpu.matmul %17, %16, %cst_12 {dimension_numbers = #tpu.dot_dimension_numbers<[1], [0], [0], [1], [0, 0, 1, 1], [], []>} : vector<4x16xbf16>, vector<16x128xbf16>, vector<4x128xf32> -> vector<4x128xf32>
    %20 = vector.broadcast %18 : vector<4x1xf32> to vector<4x128xf32>
    %21 = arith.addf %19, %20 : vector<4x128xf32>
    %cst_13 = arith.constant 0.000000e+00 : f32
    %22 = vector.broadcast %cst_13 : f32 to vector<4x128xf32>
    %23 = arith.maximumf %21, %22 : vector<4x128xf32>
    %24 = arith.truncf %23 : vector<4x128xf32> to vector<4x128xbf16>
    %c48 = arith.constant 48 : index
    %c0_14 = arith.constant 0 : index
    %25 = vector.load %arg2[%c48, %c0_14] : memref<64x32xbf16, #tpu.memory_space<vmem>>, vector<8x4xbf16>
    %c0_15 = arith.constant 0 : index
    %c3 = arith.constant 3 : index
    %26 = vector.load %arg3[%c0_15, %c3] : memref<16x4xf32, #tpu.memory_space<vmem>>, vector<8x1xf32>
    %cst_16 = arith.constant dense<0.000000e+00> : vector<8x128xf32>
    %27 = tpu.matmul %25, %24, %cst_16 {dimension_numbers = #tpu.dot_dimension_numbers<[1], [0], [0], [1], [0, 0, 1, 1], [], []>} : vector<8x4xbf16>, vector<4x128xbf16>, vector<8x128xf32> -> vector<8x128xf32>
    %28 = vector.broadcast %26 : vector<8x1xf32> to vector<8x128xf32>
    %29 = arith.addf %27, %28 : vector<8x128xf32>
    %c0_17 = arith.constant 0 : index
    %c0_18 = arith.constant 0 : index
    %30 = vector.load %arg4[%c0_17, %c0_18] : memref<8x128xf32, #tpu.memory_space<vmem>>, vector<8x128xf32>
    tpu.vector_store %arg4[%c0_17, %c0_18], %29 {strides = array<i32>} : memref<8x128xf32, #tpu.memory_space<vmem>>, vector<8x128xf32>,
    return
  }
  func.func @transform_0(%arg0: i32) -> (i32, i32) {
    %c0_i32 = arith.constant 0 : i32
    %c0_i32_0 = arith.constant 0 : i32
    return %c0_i32, %arg0 : i32, i32
  }
  func.func @transform_1(%arg0: i32) -> (i32, i32) {
    %c0_i32 = arith.constant 0 : i32
    %c0_i32_0 = arith.constant 0 : i32
    %c0_i32_1 = arith.constant 0 : i32
    return %c0_i32, %c0_i32_0 : i32, i32
  }
  func.func @transform_2(%arg0: i32) -> (i32, i32) {
    %c0_i32 = arith.constant 0 : i32
    %c0_i32_0 = arith.constant 0 : i32
    %c0_i32_1 = arith.constant 0 : i32
    return %c0_i32, %c0_i32_0 : i32, i32
  }
  func.func @transform_3(%arg0: i32) -> (i32, i32) {
    %c0_i32 = arith.constant 0 : i32
    %c0_i32_0 = arith.constant 0 : i32
    return %c0_i32, %arg0 : i32, i32
  }
}

</mosaic_0001>

<bundles_post_ra>
// kernel: tpu_custom_call.1
= control target key start
LH: loop header
LB: loop body
LE: loop exit
PB: predicated region body
PF: predicated region fallthrough
CT: control target
= control target key end

     0   :  { %8 = vsyncpa [#allocation4], 0  ;;  %s893_s0 = inlined_call_operand.vmem [shape: bf16[32,256], index: 0, kind: input, shape index: {}]   ;;  %s894_s1 = inlined_call_operand.vmem [shape: bf16[64,32], index: 1, kind: input, shape index: {}]   ;;  %s895_s2 = inlined_call_operand.vmem [shape: f32[16,4], index: 2, kind: input, shape index: {}]   ;;  %s896_s3 = inlined_call_operand.hbm [shape: f32[8,256], index: 3, kind: output, shape index: {}]  }
   0x1   :  { %10 = vsyncpa [#allocation4 + $0x1], 0  ;;  %s756_s12 = smov 0   ;;  %s758_s13 = smov 0  }
   0x2   :  { %s760_s14 = smov 0   ;;  %s762_s15 = smov 0  }
   0x3 LB: > { %s555_s16 = sadd.s32 4294967295, %s727_s15   ;;  %s556_s17 = sadd.s32 4294967294, %s727_s15   ;;  %s727_s15 = sphi %s762_s15, %s902_s15   ;;  %s723_s14 = sphi %s760_s14, %s901_s14   ;;  %s719_s13 = sphi %s758_s13, %s900_s13   ;;  %s715_s12 = sphi %s756_s12, %s899_s12  }
   0x4   : > { %s779_s18 = sadd.s32 1, %s727_s15   ;;  %s23_s19 = sadd.s32 1, %s723_s14 }
   0x5   : > { %s20_s20 = ssub.s32 %s727_s15, %s779_s18  ;;  %p30_p0 = scmp.ne.s32.totalorder %s723_s14, %s719_s13 }
   0x6   : > { %p21_p1 = scmp.eq.s32.totalorder %s20_s20, 0  ;;  %p31_p2 = scmp.eq.s32.totalorder %s727_s15, 0 }
   0x7   : > { %p102_p3 = scmp.eq.s32.totalorder %s555_s16, 1  ;;  %p107_p4 = scmp.ne.s32.totalorder %s719_s13, %s715_s12 }
   0x8   : > { %s792_s21 = scalar_select %p21_p1, %s723_s14, %s23_s19  }
   0x9   : > { %p32_p5 = por %p31_p2, %p30_p0  ;;  %p794_p6 = por %p102_p3, %p30_p0 }
   0xa   : > { %p108_p7 = scmp.eq.s32.totalorder %s556_s17, 1  ;;  %p558_p9 = scmp.ge.s32.totalorder %s727_s15, 2 }
   0xc   : > { %p798_p8 = por %p108_p7, %p107_p4  ;;  %130 = sbr.rel (%p558_p9) target bundleno = 26 (0x1a), region = 24 }
  0x13   : > { %133 = sbr.rel (!%p32_p5) target bundleno = 26 (0x1a), region = 28  ;;  %s135_s24 = sand.u32 (%p32_p5), 1, %s723_s14  }
  0x14   : > { %s560_s25 = sshll.u32 (%p32_p5), %s727_s15, 2  ;;  %s559_s26 = sshll.u32 (%p32_p5), %s135_s24, 4 }
  0x15   : > { %s139_s29 = scalar_lea.vmem (%p32_p5), %s893_s0, %s560_s25  ;;  %s137_s30 = scalar_lea.vmem (%p32_p5), [#allocation2], %s559_s26 }
  0x16   : > { %v155_v0 = vld [vmem:[%s139_s29] sm:$0xf] (%p32_p5)  ;;  %v157_v1 = vld [vmem:[%s139_s29 + $0x8] sm:$0xf] (%p32_p5)  ;;  %v159_v2 = vld [vmem:[%s139_s29 + $0x10] sm:$0xf] (%p32_p5) }
  0x17   : > { %156 = vst [vmem:[%s137_s30] sm:$0xf] (%p32_p5), %v155_v0  ;;  %158 = vst [vmem:[%s137_s30 + $0x4] sm:$0xf] (%p32_p5), %v157_v1  ;;  %v161_v3 = vld [vmem:[%s139_s29 + $0x18] sm:$0xf] (%p32_p5) }
  0x18   : > { %160 = vst [vmem:[%s137_s30 + $0x8] sm:$0xf] (%p32_p5), %v159_v2  ;;  %162 = vst [vmem:[%s137_s30 + $0xc] sm:$0xf] (%p32_p5), %v161_v3 }
  0x1a PF: > { %p561_p10 = scmp.ge.s32.totalorder %s727_s15, 1  ;;  %p192_p11 = scmp.lt.s32.totalorder %s727_s15, 3 }
  0x1c   : > { %p193_p12 = pnand %p561_p10, %p192_p11 }
  0x1d   : > { %s813_s4 = sand.u32 (!%p193_p12), 1, %s719_s13   ;;  %v729_v4 = vmov (!%p193_p12), 0.0   ;;  %vm730_vm0 = vmmov (!%p193_p12), 0   ;;  %v229_v5 = vld [vmem:[%s895_s2] sm:$0xff] (!%p193_p12)  ;;  %v731_v6 = vmov (!%p193_p12), 0   ;;  %v230_v8 = vld [vmem:[%s895_s2 + $0x8] sm:$0xff] (!%p193_p12) }
  0x1e   : > { %196 = sbr.rel (%p193_p12) target bundleno = 936 (0x3a8), region = 69  ;;  %585 = vmatprep.subr.bf16.mxu0 (!%p193_p12), %v729_v4  ;;  %s562_s5 = sshll.u32 (!%p193_p12), %s813_s4, 4  ;;  %589 = vmatprep.mubr.msk.bf16.mxu0 (!%p193_p12), %vm730_vm0, %v729_v4  ;;  %v663_v10 = vld [vmem:[%s894_s1] sm:$0xff] (!%p193_p12)   ;;  %vm258_vm1 = vcmask (!%p193_p12), 261120   ;;  %v732_v11 = vmov (!%p193_p12), 1   ;;  %v664_v23 = vld [vmem:[%s894_s1 + $0x8] sm:$0xff] (!%p193_p12)  }
  0x1f   : > { %656 = vset.pattern.permute.xlu0 (!%p193_p12), %v731_v6  ;;  %593 = vmatprep.subr.bf16.mxu1 (!%p193_p12), %v729_v4  ;;  %s201_s8 = scalar_lea.vmem (!%p193_p12), [#allocation2], %s562_s5  ;;  %vm321_vm2 = vcmask (!%p193_p12), 130048   ;;  %v370_v24 = vld [vmem:[%s895_s2] sm:$0xf] (!%p193_p12)  ;;  %v733_v25 = vmov (!%p193_p12), 2   ;;  %v734_v38 = vmov (!%p193_p12), 3  }
  0x20   : > { %v661_v7 = vld [vmem:[%s201_s8] sm:$0xff] (!%p193_p12)   ;;  %233 = vperm.xlu0 (!%p193_p12), %656, %v229_v5   ;;  %595 = vmatprep.mubr.msk.bf16.mxu1 (!%p193_p12), %vm730_vm0, %v729_v4  ;;  %v662_v9 = vld [vmem:[%s201_s8 + $0x8] sm:$0xff] (!%p193_p12)   ;;  %vm432_vm3 = vcmask (!%p193_p12), 1041408   ;;  %vm428_vm4 = vcmask (!%p193_p12), 31744   ;;  %s563_s30 = sshll.u32 (!%p193_p12), %s813_s4, 3  ;;  %s573_s5 = sshll.u32 (!%p193_p12), %s555_s16, 7 }
  0x21   : > { %586 = vmatpush3.bf16.msra.mxu0 (!%p193_p12), %v661_v7  ;;  %657 = vset.pattern.permute.xlu1 (!%p193_p12), %v732_v11  ;;  %v369_v37 = vld [vmem:[%s894_s1 + $0x10] sm:$0x3] (!%p193_p12)  ;;  %v421_v48 = vld [vmem:[%s894_s1 + $0x18] sm:$0xf] (!%p193_p12)  ;;  %s221_s6 = scalar_lea.vmem (!%p193_p12), [#allocation3], %s563_s30  ;;  %s849_s10 = scalar_lea.hbm (!%p193_p12), %s896_s3, %s573_s5 }
  0x22   : > { %587 = vmatprep.subr.bf16.mxu0 (!%p193_p12), %v729_v4  ;;  %309 = vperm.xlu1 (!%p193_p12), %657, %v229_v5   ;;  %s491_s7 = sshll.u32 (!%p193_p12), %s221_s6, 4  ;;  %s478_s11 = scalar_lea.sflag (!%p193_p12), [#allocation4], %s813_s4  ;;  %s851_s7 = int_to_ptr.vmem [resolvable:$true] %s491_s7 }
  0x23   : > { %s665_s16 = scalar_lea.vmem (!%p193_p12), %s851_s7, 128  ;;  %s735_s17 = smov (!%p193_p12), [#allocation3]  }
  0x24   : > { %238 = vperm.xlu0 (!%p193_p12), %656, %v230_v8   ;;  %p666_p13 = scmp.ne.s32.totalorder (!%p193_p12), %s851_s7, %s665_s16  ;;  %s669_s19 = sshll.u32 (!%p193_p12), %s735_s17, 4  ;;  %s670_s19 = int_to_ptr.vmem [resolvable:$false] %s669_s19 }
  0x25   : > { %588 = vmatpush3.bf16.msra.mxu0 %v662_v9  ;;  %s671_s20 = scalar_lea.vmem %s670_s19, 256  ;;  %p672_p2 = scmp.lt.s32.totalorder %s851_s7, %s670_s19 }
  0x26   : > { %605 = vmatprep.subr.bf16.mxu0 %v729_v4  ;;  %313 = vperm.xlu1 %657, %v230_v8   ;;  %p667_p0 = pnand %p666_p13, %p794_p6  ;;  %p673_p3 = scmp.lt.s32.totalorder %s671_s20, %s665_s16 }
  0x28   : > { %590 = vmatmul.mubr.msk.bf16.vlgmr.msra.gmra.mrb[0].mxu0 %vm258_vm1, %v663_v10  ;;  %658 = vset.pattern.permute.xlu0 %v733_v25  ;;  %p668_p1 = pneg %p667_p0  ;;  %p674_p4 = por %p673_p3, %p672_p2 }
  0x29   : > { %607 = vmatprep.mubr.msk.bf16.mxu0 %vm730_vm0, %v729_v4  ;;  %373 = vperm.xlu0 %658, %v370_v24  }
  0x2a   : > { %659 = vset.pattern.permute.xlu1 %v734_v38  ;;  %p675_p5 = pnand %p674_p4, %p668_p1 }
  0x2b   : > { %425 = vperm.xlu1 %659, %v229_v5  }
  0x2d   : > { %660 = vset.pattern.permute.xlu0 %v734_v38 }
  0x9f   : > { %v234_v12 = vpop.permute.xlu0 %233 }
  0xa1   : > { %v310_v26 = vpop.permute.xlu1 %309 }
  0xa3   : > { %v239_v16 = vpop.permute.xlu0 %238 }
  0xa5   : > { %v314_v30 = vpop.permute.xlu1 %313 }
  0xa8   : > { %v374_v39 = vpop.permute.xlu0 %373 }
  0xaa   : > { %v426_v49 = vpop.permute.xlu1 %425 }
  0xfb   : > { %v296_v13 = vpop.f32.mrb[0].mxu0 }
  0xfc   : > { %v297_v14 = vadd.f32 %v296_v13, %v234_v12  ;;  %v591_v15 = vpop.f32.mrb[1].mxu0 }
  0xfd   : > { %v299_v17 = vpop.f32.mrb[2].mxu0 }
  0xfe   : > { %v300_v18 = vadd.f32 %v299_v17, %v239_v16  ;;  %v592_v19 = vpop.f32.mrb[3].mxu0  ;;  %v303_v20 = vmax.f32 %v297_v14, 0.0 }
 0x100   : > { %v304_v21 = vmax.f32 %v300_v18, 0.0 }
 0x102   : > { %v305_v22 = vpack.c.bf16 %v304_v21, %v303_v20 }
 0x104   : > { %594 = vmatpush3.bf16.msra.mxu1 %v305_v22 }
 0x105   : > { %599 = vmatprep.subr.bf16.mxu1 %v729_v4 }
 0x107   : > { %596 = vmatmul.mubr.msk.bf16.vlgmr.msra.gmra.mrb[0].mxu1 %vm321_vm2, %v664_v23 }
 0x108   : > { %601 = vmatprep.mubr.msk.bf16.mxu1 %vm730_vm0, %v729_v4 }
 0x1da   : > { %v359_v27 = vpop.f32.mrb[0].mxu1 }
 0x1db   : > { %v360_v28 = vadd.f32 %v359_v27, %v310_v26  ;;  %v597_v29 = vpop.f32.mrb[1].mxu1 }
 0x1dc   : > { %v362_v31 = vpop.f32.mrb[2].mxu1 }
 0x1dd   : > { %v363_v32 = vadd.f32 %v362_v31, %v314_v30  ;;  %v598_v33 = vpop.f32.mrb[3].mxu1  ;;  %v366_v34 = vmax.f32 %v360_v28, 0.0 }
 0x1df   : > { %v367_v35 = vmax.f32 %v363_v32, 0.0 }
 0x1e1   : > { %v368_v36 = vpack.c.bf16 %v367_v35, %v366_v34 }
 0x1e3   : > { %600 = vmatpush3.bf16.msra.mxu1 %v368_v36 }
 0x1e6   : > { %602 = vmatmul.mubr.msk.bf16.vlgmr.msra.gmra.mrb[4].mxu1 %vm321_vm2, %v369_v37 }
 0x2b9   : > { %v413_v40 = vpop.f32.mrb[4].mxu1 }
 0x2ba   : > { %v414_v41 = vadd.f32 %v413_v40, %v374_v39  ;;  %v603_v42 = vpop.f32.mrb[5].mxu1 }
 0x2bb   : > { %v416_v43 = vpop.f32.mrb[6].mxu1 }
 0x2bc   : > { %v419_v44 = vmax.f32 %v414_v41, 0.0  ;;  %v604_v45 = vpop.f32.mrb[7].mxu1 }
 0x2be   : > { %v420_v46 = vpack.c.bf16 %v419_v44, %v419_v44 }
 0x2c0   : > { %v434_v47 = vsel %vm432_vm3, %v420_v46, 0 }
 0x2c1   : > { %606 = vmatpush3.bf16.msra.mxu0 %v434_v47 }
 0x2c4   : > { %608 = vmatmul.mubr.msk.bf16.vlgmr.msra.gmra.mrb[4].mxu0 %vm428_vm4, %v421_v48 }
 0x397   : > { %v470_v50 = vpop.f32.mrb[4].mxu0 }
 0x398   : > { %v609_v51 = vpop.f32.mrb[5].mxu0  ;;  %v471_v52 = vadd.f32 %v470_v50, %v426_v49 }
 0x399   : > { %v473_v53 = vpop.f32.mrb[6].mxu0 }
 0x39a   : > { %476 = vst [vmem:[%s221_s6] sm:$0xff] %v471_v52  ;;  %v610_v54 = vpop.f32.mrb[7].mxu0 }
 0x39b   : > { %678 = shalt.err (!%p675_p5)
}
 0x39c   : > { %s679_s4 = scalar_lea.hbm %s849_s10, 128  ;;  %s683_s26 = scalar_lea.hbm %s896_s3, 256 }
 0x39d   : > { %p680_p7 = scmp.ne.s32.totalorder %s849_s10, %s679_s4  ;;  %p684_p12 = scmp.lt.u32.totalorder %s849_s10, %s896_s3 }
 0x39e   : > { %p685_p13 = scmp.lt.u32.totalorder %s683_s26, %s679_s4  ;;  %p687_p1 = scmp.lt.u32.totalorder %s679_s4, %s849_s10 }
 0x39f   : > { %p681_p10 = pnand %p680_p7, %p794_p6 }
 0x3a0   : > { %p686_p0 = por %p685_p13, %p684_p12 }
 0x3a1   : > { %p682_p11 = pneg %p681_p10 }
 0x3a2   : > { %p688_p2 = por %p687_p1, %p686_p0 }
 0x3a4   : > { %p689_p3 = pnand %p688_p2, %p682_p11 }
 0x3a6   : > { %692 = shalt.err (!%p689_p3)
}
 0x3a7   : > { %611 = dma.vmem_to_hbm [thread:$0]  (%p794_p6), %s851_s7, 128, %s849_s10, %s478_s11  }
 0x3a8 PF: > { %s503_s29 = sand.u32 1, %s715_s12   ;;  %p614_p4 = pnand %p558_p9, %p798_p8 }
 0x3a9   : > { %s504_s30 = scalar_lea.sflag [#allocation4], %s503_s29 }
 0x3aa   : > { %710 = dma.done.wait (!%p614_p4), %s504_s30, 128  }
 0x3ab   : > { %712 = vsyncadd (!%p614_p4), %s504_s30, 4294967168  ;;  %p13_p5 = scmp.ge.s32.totalorder %s779_s18, 4   ;;  %s899_s12 = smov %s719_s13 }
 0x3ac   : > { %s900_s13 = smov %s723_s14  ;;  %s901_s14 = smov %s792_s21 }
 0x3ad   : > { %s902_s15 = smov %s779_s18  ;;  %15 = sbr.rel (!%p13_p5) target bundleno = 3 (0x3), region = 113 }
 0x3b4   :  { %509 = vsyncpa [#allocation4], 1 }
 0x3b5   :  { %511 = vsyncpa [#allocation4 + $0x1], 1 }

</bundles_post_ra>
